<compile_context>
chip_gen: v6e
topology: v6e:2x2x1
jax: 0.10.0
libtpu: 0.0.40
codegen_flags: <defaults>
</compile_context>

<pallas_src>
import math
import functools

import jax
import jax.numpy as jnp
from jax.experimental import pallas as pl
from jax.experimental.pallas import tpu as pltpu


def _self_attention_kernel(q_ref, k_ref, v_ref, wq_ref, wk_ref, wv_ref, o_ref,
                           *, bt, s, e, bf16_exp):
    """q/k/v_ref: (bt, s, e) input dtype;  w*_ref: (e, e) bf16 (transposed,
       scale folded into wq);  o_ref: (bt, s, e) input dtype."""
    rows = bt * s

    # In-register bf16 cast for the MXU (no host-side pad/cast/concat pass).
    q = q_ref[...].reshape(rows, e).astype(jnp.bfloat16)
    k = k_ref[...].reshape(rows, e).astype(jnp.bfloat16)
    v = v_ref[...].reshape(rows, e).astype(jnp.bfloat16)

    # Three thin projections, f32 MXU accumulation, no in-kernel transposes.
    qp = jnp.dot(q, wq_ref[...], preferred_element_type=jnp.float32)
    kp = jnp.dot(k, wk_ref[...], preferred_element_type=jnp.float32)
    vp = jnp.dot(v, wv_ref[...], preferred_element_type=jnp.float32)

    qp = qp.reshape(bt, s, e).astype(jnp.bfloat16)
    kp = kp.reshape(bt, s, e).astype(jnp.bfloat16)
    vp = vp.reshape(bt, s, e).astype(jnp.bfloat16)

    # Scaled scores (1/sqrt(E) already folded into wq); contraction over the
    # last axes of both operands, so no K transpose.
    scores = jnp.einsum('bqe,bke->bqk', qp, kp,
                        preferred_element_type=jnp.float32)        # (bt, s, s)

    # Numerically stable softmax with deferred normalization.
    m = jnp.max(scores, axis=-1, keepdims=True)
    z = scores - m
    if bf16_exp:                       # v6e / v7x: bf16-capable VPU/EUP
        z = z.astype(jnp.bfloat16)
    p = jnp.exp(z)                                                  # (bt, s, s)
    l = jnp.sum(p.astype(jnp.float32), axis=-1, keepdims=True)      # (bt, s, 1)

    # Un-normalized attention output, then normalize the (s, e) result with an
    # approx reciprocal (EUP slot) -- cheaper than dividing the (s, s) probs.
    out = jnp.einsum('bqk,bke->bqe', p.astype(jnp.bfloat16), vp,
                     preferred_element_type=jnp.float32)            # (bt, s, e)
    out = out * pl.reciprocal(l, approx=True)

    o_ref[...] = out.astype(o_ref.dtype)


def prepare_weights(wq, wk, wv):
    """One-time parameter prep (call at load time, not per forward):
       transpose PyTorch (out,in) -> (in,out), fold 1/sqrt(E) into Wq, bf16."""
    E = wq.shape[-1]
    scale = 1.0 / math.sqrt(E)
    return ((wq.T * scale).astype(jnp.bfloat16),
            wk.T.astype(jnp.bfloat16),
            wv.T.astype(jnp.bfloat16))


def self_attention(query, key, value, wq_t, wk_t, wv_t, *, block_b=None):
    """query/key/value: (B, S, E); wq_t/wk_t/wv_t: prepared (E, E) bf16."""
    B, S, E = query.shape

    # ---- per-generation tuning knobs ---------------------------------------
    dk = jax.devices()[0].device_kind.lower()
    if 'v5' in dk or 'v4' in dk or 'v3' in dk or 'v2' in dk:
        row_cap, score_budget, vmem_cap = 1024, 6 << 20, 96 << 20
        bf16_exp = False            # no bf16 VPU/EUP on v5e and older
    elif 'v7' in dk:
        row_cap, score_budget, vmem_cap = 2048, 12 << 20, 48 << 20
        bf16_exp = True
    else:                           # v6e and default
        row_cap, score_budget, vmem_cap = 4096, 24 << 20, 100 << 20
        bf16_exp = True

    # ---- block_b selection: amortize per-step overhead, but keep >= 2 grid
    # steps when B > 1 so both v7x TensorCores get work ----------------------
    if block_b is None:
        max_bb = B if B == 1 else max(1, B // 2)
        block_b = 1
        for d in range(1, max_bb + 1):
            if B % d == 0 and d * S <= row_cap and d * S * S * 4 <= score_budget:
                block_b = d
    assert B % block_b == 0, "block_b must divide B"

    # ---- VMEM budget estimate -> vmem_limit_bytes --------------------------
    rows = block_b * S
    itemsize = query.dtype.itemsize
    p_bytes = 2 if bf16_exp else 4
    est = (2 * 3 * rows * E * itemsize        # double-buffered q/k/v blocks
           + 2 * rows * E * itemsize          # double-buffered output block
           + 3 * E * E * 2                    # resident bf16 weights (1 copy)
           + 3 * rows * E * (4 + 2)           # f32 + bf16 projected q/k/v
           + block_b * S * S * (4 + p_bytes)  # scores (f32) + exp'd probs
           + rows * E * 4)                    # f32 un-normalized output
    vmem_limit = int(min(vmem_cap, max(32 << 20, 2 * est)))

    kernel = functools.partial(_self_attention_kernel,
                               bt=block_b, s=S, e=E, bf16_exp=bf16_exp)

    act_spec = pl.BlockSpec((block_b, S, E), lambda i: (i, 0, 0))
    # Grid-invariant weights: whole array resident in VMEM, single copy
    # (no per-step DMA, no double buffering).
    w_spec = pl.BlockSpec(memory_space=pltpu.MemorySpace.VMEM)

    out = pl.pallas_call(
        kernel,
        out_shape=jax.ShapeDtypeStruct((B, S, E), query.dtype),
        grid=(B // block_b,),
        in_specs=[act_spec, act_spec, act_spec, w_spec, w_spec, w_spec],
        out_specs=pl.BlockSpec((block_b, S, E), lambda i: (i, 0, 0)),
        compiler_params=pltpu.CompilerParams(
            dimension_semantics=("parallel",),
            vmem_limit_bytes=vmem_limit),
    )(query, key, value, wq_t, wk_t, wv_t)

    return out


def self_attention_ref(query, key, value, wq, wk, wv):
    Q = query @ wq.T
    K = key @ wk.T
    V = value @ wv.T
    s = jnp.einsum('bqe,bke->bqk', Q, K) / math.sqrt(Q.shape[-1])
    a = jax.nn.softmax(s, axis=-1)
    return jnp.einsum('bqs,bse->bqe', a, V)


if __name__ == "__main__":
    B, S, E = 2, 8, 32  # batch, seq, embed_size

    key0 = jax.random.PRNGKey(0)
    kq, kk, kv, kwq, kwk, kwv = jax.random.split(key0, 6)

    query = jax.random.normal(kq, (B, S, E), dtype=jnp.float32)
    key_ = jax.random.normal(kk, (B, S, E), dtype=jnp.float32)
    value = jax.random.normal(kv, (B, S, E), dtype=jnp.float32)

    # Deterministic parameter init (Kaiming-uniform-ish like nn.Linear).
    bound = 1.0 / math.sqrt(E)
    wq = jax.random.uniform(kwq, (E, E), jnp.float32, -bound, bound)
    wk = jax.random.uniform(kwk, (E, E), jnp.float32, -bound, bound)
    wv = jax.random.uniform(kwv, (E, E), jnp.float32, -bound, bound)

    # One-time weight prep (parameter-load time), not in the per-call path.
    wq_t, wk_t, wv_t = prepare_weights(wq, wk, wv)

    out = self_attention(query, key_, value, wq_t, wk_t, wv_t)
    out = jax.block_until_ready(out)

    ref = self_attention_ref(query, key_, value, wq, wk, wv)
    assert out.shape == (B, S, E)
    # bf16 MXU inputs/weights + approx reciprocal => compare against the f32
    # reference with correspondingly loosened tolerance.
    assert jnp.allclose(out, ref, atol=2e-2, rtol=2e-2), "mismatch vs reference"

    print("KERNEL_OK")
</pallas_src>

<mosaic_0001>
module attributes {stable_mosaic.version = 11 : i64} {
  func.func @_self_attention_kernel(%arg0: i32, %arg1: memref<1x8x32xf32, #tpu.memory_space<vmem>>, %arg2: memref<1x8x32xf32, #tpu.memory_space<vmem>>, %arg3: memref<1x8x32xf32, #tpu.memory_space<vmem>>, %arg4: memref<32x32xbf16, #tpu.memory_space<vmem>>, %arg5: memref<32x32xbf16, #tpu.memory_space<vmem>>, %arg6: memref<32x32xbf16, #tpu.memory_space<vmem>>, %arg7: memref<1x8x32xf32, #tpu.memory_space<vmem>>) attributes {dimension_semantics = [#tpu.dimension_semantics<parallel>], iteration_bounds = array<i64: 2>, scalar_prefetch = 0 : i64, scratch_operands = 0 : i64, tpu.core_type = #tpu.core_type<tc>, window_params = [{transform_indices = @transform_0, window_bounds = array<i64: 1, 8, 32>}, {transform_indices = @transform_1, window_bounds = array<i64: 1, 8, 32>}, {transform_indices = @transform_2, window_bounds = array<i64: 1, 8, 32>}, {pipeline_mode = #tpu.pipeline_mode<synchronous>, transform_indices = @transform_3, window_bounds = array<i64: 32, 32>}, {pipeline_mode = #tpu.pipeline_mode<synchronous>, transform_indices = @transform_4, window_bounds = array<i64: 32, 32>}, {pipeline_mode = #tpu.pipeline_mode<synchronous>, transform_indices = @transform_5, window_bounds = array<i64: 32, 32>}, {transform_indices = @transform_6, window_bounds = array<i64: 1, 8, 32>}]} {
    %c0 = arith.constant 0 : index
    %c0_0 = arith.constant 0 : index
    %c0_1 = arith.constant 0 : index
    %0 = vector.load %arg1[%c0, %c0_0, %c0_1] : memref<1x8x32xf32, #tpu.memory_space<vmem>>, vector<1x8x32xf32>
    %1 = vector.shape_cast %0 : vector<1x8x32xf32> to vector<8x32xf32>
    %2 = arith.truncf %1 : vector<8x32xf32> to vector<8x32xbf16>
    %c0_2 = arith.constant 0 : index
    %c0_3 = arith.constant 0 : index
    %c0_4 = arith.constant 0 : index
    %3 = vector.load %arg2[%c0_2, %c0_3, %c0_4] : memref<1x8x32xf32, #tpu.memory_space<vmem>>, vector<1x8x32xf32>
    %4 = vector.shape_cast %3 : vector<1x8x32xf32> to vector<8x32xf32>
    %5 = arith.truncf %4 : vector<8x32xf32> to vector<8x32xbf16>
    %c0_5 = arith.constant 0 : index
    %c0_6 = arith.constant 0 : index
    %c0_7 = arith.constant 0 : index
    %6 = vector.load %arg3[%c0_5, %c0_6, %c0_7] : memref<1x8x32xf32, #tpu.memory_space<vmem>>, vector<1x8x32xf32>
    %7 = vector.shape_cast %6 : vector<1x8x32xf32> to vector<8x32xf32>
    %8 = arith.truncf %7 : vector<8x32xf32> to vector<8x32xbf16>
    %c0_8 = arith.constant 0 : index
    %c0_9 = arith.constant 0 : index
    %9 = vector.load %arg4[%c0_8, %c0_9] : memref<32x32xbf16, #tpu.memory_space<vmem>>, vector<32x32xbf16>
    %cst = arith.constant dense<0.000000e+00> : vector<8x32xf32>
    %10 = tpu.matmul %2, %9, %cst {dimension_numbers = #tpu.dot_dimension_numbers<[1], [0], [0], [1], [0, 0, 1, 1], [], []>} : vector<8x32xbf16>, vector<32x32xbf16>, vector<8x32xf32> -> vector<8x32xf32>
    %c0_10 = arith.constant 0 : index
    %c0_11 = arith.constant 0 : index
    %11 = vector.load %arg5[%c0_10, %c0_11] : memref<32x32xbf16, #tpu.memory_space<vmem>>, vector<32x32xbf16>
    %cst_12 = arith.constant dense<0.000000e+00> : vector<8x32xf32>
    %12 = tpu.matmul %5, %11, %cst_12 {dimension_numbers = #tpu.dot_dimension_numbers<[1], [0], [0], [1], [0, 0, 1, 1], [], []>} : vector<8x32xbf16>, vector<32x32xbf16>, vector<8x32xf32> -> vector<8x32xf32>
    %c0_13 = arith.constant 0 : index
    %c0_14 = arith.constant 0 : index
    %13 = vector.load %arg6[%c0_13, %c0_14] : memref<32x32xbf16, #tpu.memory_space<vmem>>, vector<32x32xbf16>
    %cst_15 = arith.constant dense<0.000000e+00> : vector<8x32xf32>
    %14 = tpu.matmul %8, %13, %cst_15 {dimension_numbers = #tpu.dot_dimension_numbers<[1], [0], [0], [1], [0, 0, 1, 1], [], []>} : vector<8x32xbf16>, vector<32x32xbf16>, vector<8x32xf32> -> vector<8x32xf32>
    %15 = vector.shape_cast %10 : vector<8x32xf32> to vector<1x8x32xf32>
    %16 = arith.truncf %15 : vector<1x8x32xf32> to vector<1x8x32xbf16>
    %17 = vector.shape_cast %12 : vector<8x32xf32> to vector<1x8x32xf32>
    %18 = arith.truncf %17 : vector<1x8x32xf32> to vector<1x8x32xbf16>
    %19 = vector.shape_cast %14 : vector<8x32xf32> to vector<1x8x32xf32>
    %20 = arith.truncf %19 : vector<1x8x32xf32> to vector<1x8x32xbf16>
    "tpu.trace_start"() <{level = 10 : i32, message = "bqe,bke->bqk"}> : () -> ()
    %cst_16 = arith.constant dense<0.000000e+00> : vector<1x8x8xf32>
    %21 = tpu.matmul %16, %18, %cst_16 {dimension_numbers = #tpu.dot_dimension_numbers<[2], [2], [1], [1], [0, 0, 0, 1, 1, 1], [0], [0]>} : vector<1x8x32xbf16>, vector<1x8x32xbf16>, vector<1x8x8xf32> -> vector<1x8x8xf32>
    "tpu.trace_stop"() : () -> ()
    %cst_17 = arith.constant dense<0xFF800000> : vector<1x8xf32>
    %22 = vector.multi_reduction <maximumf>, %21, %cst_17 [2] : vector<1x8x8xf32> to vector<1x8xf32>
    %23 = vector.shape_cast %22 : vector<1x8xf32> to vector<1x8x1xf32>
    %24 = vector.broadcast %23 : vector<1x8x1xf32> to vector<1x8x8xf32>
    %25 = arith.subf %21, %24 : vector<1x8x8xf32>
    %26 = arith.truncf %25 : vector<1x8x8xf32> to vector<1x8x8xbf16>
    %27 = math.exp %26 : vector<1x8x8xbf16>
    %28 = arith.extf %27 : vector<1x8x8xbf16> to vector<1x8x8xf32>
    %cst_18 = arith.constant dense<0.000000e+00> : vector<1x8xf32>
    %29 = vector.multi_reduction <add>, %28, %cst_18 [2] : vector<1x8x8xf32> to vector<1x8xf32>
    %30 = vector.shape_cast %29 : vector<1x8xf32> to vector<1x8x1xf32>
    "tpu.trace_start"() <{level = 10 : i32, message = "bqk,bke->bqe"}> : () -> ()
    %cst_19 = arith.constant dense<0.000000e+00> : vector<1x8x32xf32>
    %31 = tpu.matmul %27, %20, %cst_19 {dimension_numbers = #tpu.dot_dimension_numbers<[2], [1], [1], [2], [0, 0, 0, 1, 1, 2], [0], [0]>} : vector<1x8x8xbf16>, vector<1x8x32xbf16>, vector<1x8x32xf32> -> vector<1x8x32xf32>
    "tpu.trace_stop"() : () -> ()
    %32 = tpu.reciprocal %30 {approx = true} : vector<1x8x1xf32> -> vector<1x8x1xf32>
    %33 = vector.broadcast %32 : vector<1x8x1xf32> to vector<1x8x32xf32>
    %34 = arith.mulf %31, %33 : vector<1x8x32xf32>
    %c0_20 = arith.constant 0 : index
    %c0_21 = arith.constant 0 : index
    %c0_22 = arith.constant 0 : index
    %35 = vector.load %arg7[%c0_20, %c0_21, %c0_22] : memref<1x8x32xf32, #tpu.memory_space<vmem>>, vector<1x8x32xf32>
    tpu.vector_store %arg7[%c0_20, %c0_21, %c0_22], %34 {strides = array<i32>} : memref<1x8x32xf32, #tpu.memory_space<vmem>>, vector<1x8x32xf32>,
    return
  }
  func.func @transform_0(%arg0: i32) -> (i32, i32, i32) {
    %c0_i32 = arith.constant 0 : i32
    %c0_i32_0 = arith.constant 0 : i32
    %c0_i32_1 = arith.constant 0 : i32
    return %arg0, %c0_i32, %c0_i32_0 : i32, i32, i32
  }
  func.func @transform_1(%arg0: i32) -> (i32, i32, i32) {
    %c0_i32 = arith.constant 0 : i32
    %c0_i32_0 = arith.constant 0 : i32
    %c0_i32_1 = arith.constant 0 : i32
    return %arg0, %c0_i32, %c0_i32_0 : i32, i32, i32
  }
  func.func @transform_2(%arg0: i32) -> (i32, i32, i32) {
    %c0_i32 = arith.constant 0 : i32
    %c0_i32_0 = arith.constant 0 : i32
    %c0_i32_1 = arith.constant 0 : i32
    return %arg0, %c0_i32, %c0_i32_0 : i32, i32, i32
  }
  func.func @transform_3(%arg0: i32) -> (i32, i32) {
    %c0_i32 = arith.constant 0 : i32
    %c0_i32_0 = arith.constant 0 : i32
    %c0_i32_1 = arith.constant 0 : i32
    return %c0_i32, %c0_i32_0 : i32, i32
  }
  func.func @transform_4(%arg0: i32) -> (i32, i32) {
    %c0_i32 = arith.constant 0 : i32
    %c0_i32_0 = arith.constant 0 : i32
    %c0_i32_1 = arith.constant 0 : i32
    return %c0_i32, %c0_i32_0 : i32, i32
  }
  func.func @transform_5(%arg0: i32) -> (i32, i32) {
    %c0_i32 = arith.constant 0 : i32
    %c0_i32_0 = arith.constant 0 : i32
    %c0_i32_1 = arith.constant 0 : i32
    return %c0_i32, %c0_i32_0 : i32, i32
  }
  func.func @transform_6(%arg0: i32) -> (i32, i32, i32) {
    %c0_i32 = arith.constant 0 : i32
    %c0_i32_0 = arith.constant 0 : i32
    %c0_i32_1 = arith.constant 0 : i32
    return %arg0, %c0_i32, %c0_i32_0 : i32, i32, i32
  }
}

</mosaic_0001>

<bundles_post_ra>
// kernel: tpu_custom_call.1
= control target key start
LH: loop header
LB: loop body
LE: loop exit
PB: predicated region body
PF: predicated region fallthrough
CT: control target
= control target key end

     0   :  { %s1600_s0 = inlined_call_operand.hbm [shape: f32[2,8,32], index: 0, kind: input, shape index: {}]   ;;  %s1601_s1 = inlined_call_operand.hbm [shape: f32[2,8,32], index: 1, kind: input, shape index: {}]   ;;  %s1602_s2 = inlined_call_operand.hbm [shape: f32[2,8,32], index: 2, kind: input, shape index: {}]   ;;  %s1603_s3 = inlined_call_operand.hbm [shape: bf16[32,32], index: 3, kind: input, shape index: {}]   ;;  %s1604_s4 = inlined_call_operand.hbm [shape: bf16[32,32], index: 4, kind: input, shape index: {}]   ;;  %s1605_s5 = inlined_call_operand.hbm [shape: bf16[32,32], index: 5, kind: input, shape index: {}]   ;;  %s1606_s6 = inlined_call_operand.hbm [shape: f32[2,8,32], index: 6, kind: output, shape index: {}]  }
   0x1   :  { %1623 = sst [smem:[#allocation23_spill]] %s1601_s1 }
   0x2   :  { %1624 = sst [smem:[#allocation24_spill]] %s1603_s3 }
   0x3   :  { %11 = vsyncpa [#allocation3], 0 }
   0x4   :  { %13 = vsyncpa [#allocation3 + $0x1], 0 }
   0x5   :  { %14 = vsyncpa [#allocation6], 0 }
   0x6   :  { %16 = vsyncpa [#allocation6 + $0x1], 0 }
   0x7   :  { %17 = vsyncpa [#allocation9], 0 }
   0x8   :  { %18 = vsyncpa [#allocation12], 0 }
   0x9   :  { %19 = vsyncpa [#allocation4], 0 }
   0xa   :  { %21 = vsyncpa [#allocation4 + $0x1], 0  ;;  %s1306_s21 = smov 0   ;;  %s1308_s22 = smov 0  }
   0xb   :  { %s1310_s23 = smov 0   ;;  %s1312_s24 = smov 0  }
   0xc LB: > { %1625 = sst [smem:[#allocation19_spill]] %s1258_s24  ;;  %s1327_s25 = sadd.s32 4294967295, %s1258_s24   ;;  %s1258_s24 = sphi %s1312_s24, %s1655_s24   ;;  %s1254_s23 = sphi %s1310_s23, %s1659_s23   ;;  %s1250_s22 = sphi %s1308_s22, %s1658_s22   ;;  %s1246_s21 = sphi %s1306_s21, %s1657_s21  }
   0xd   : > { %s835_s26 = sadd.s32 4294967294, %s1258_s24   ;;  %p47_p0 = scmp.ne.s32.totalorder %s1250_s22, %s1246_s21 }
   0xe   : > { %p1612_p1 = scmp.eq.s32.totalorder %s1327_s25, 0  ;;  %p186_p2 = scmp.eq.s32.totalorder %s1327_s25, 1 }
   0xf   : > { %p192_p3 = scmp.eq.s32.totalorder %s835_s26, 1  ;;  %p836_p5 = scmp.ge.s32.totalorder %s1258_s24, 1 }
  0x10   : > { %p1336_p4 = por %p1612_p1, %p47_p0  ;;  %p199_p7 = scmp.lt.s32.totalorder %s1258_s24, 3 }
  0x11   : > { %p1341_p6 = por %p192_p3, %p47_p0  ;;  %s1260_s30 = smov [#allocation8]  }
  0x12   : > { %s1626_s27 = scalar_select %p1336_p4, 1, 0 }
  0x13   : > { %s1627_s28 = scalar_select %p1341_p6, 1, 0 }
  0x14   : > { %p1346_p8 = pnand %p836_p5, %p199_p7  ;;  %s211_s7 = sshll.u32 %s1260_s30, 4  ;;  %s212_s7 = int_to_ptr.vmem [resolvable:$true] %s211_s7 }
  0x15   : > { %1628 = sst [smem:[#allocation20_spill]] %s1627_s28  ;;  %s1360_s9 = sadd.s32 1, %s1258_s24  }
  0x16   : > { %s1629_s29 = scalar_select %p1346_p8, 1, 0 }
  0x17   : > { %p939_p9 = pneg %p1346_p8  ;;  %1631 = sst [smem:[#allocation21_spill]] %s1360_s9 }
  0x18   : > { %s34_s10 = sadd.s32 1, %s1254_s23  ;;  %s31_s11 = ssub.s32 %s1258_s24, %s1360_s9 }
  0x19   : > { %p1355_p11 = pnand %p939_p9, %p1612_p1  ;;  %s1031_s12 = scalar_lea.vmem %s212_s7, 256 }
  0x1a   : > { %p1032_p13 = scmp.ne.s32.totalorder %s212_s7, %s1031_s12  ;;  %p1039_p5 = scmp.lt.s32.totalorder %s212_s7, %s212_s7 }
  0x1b   : > { %s1630_s8 = scalar_select %p1355_p11, 1, 0 }
  0x1c   : > { %p1613_p12 = pneg %p1355_p11  ;;  %p1040_p7 = scmp.lt.s32.totalorder %s1031_s12, %s1031_s12 }
  0x1e   : > { %p1034_p0 = pnand %p1032_p13, %p1613_p12  ;;  %p1041_p9 = por %p1040_p7, %p1039_p5 }
  0x20   : > { %p1035_p3 = pneg %p1034_p0 }
  0x22   : > { %p1042_p10 = pnand %p1041_p9, %p1035_p3 }
  0x24   : > { %1045 = shalt.err (!%p1042_p10)
}
  0x25   : > { %s1608_s13 = smov 64   ;;  %s1610_s14 = smov 4  }
  0x26   : > { %s1632_s3 = sld [smem:[#allocation24_spill]]  ;;  %p32_p10 = scmp.eq.s32.totalorder %s31_s11, 0 }
  0x27   : > { %p41_p13 = scmp.ne.s32.totalorder %s1254_s23, %s1250_s22  ;;  %p42_p0 = scmp.eq.s32.totalorder %s1258_s24, 0 }
  0x28   : > { %p966_p3 = scmp.lt.s32.totalorder %s1258_s24, 2  ;;  %s1607_s19 = sand.u32 1, %s1254_s23  }
  0x29   : > { %s1383_s17 = scalar_select %p32_p10, %s1254_s23, %s34_s10  }
  0x2a   : > { %p43_p5 = por %p42_p0, %p41_p13  ;;  %p1387_p7 = por %p186_p2, %p41_p13 }
  0x2b   : > { %1633 = sst [smem:[#allocation22_spill]] %s1383_s17  ;;  %s1393_s20 = sshll.u32 %s1258_s24, 7 }
  0x2c   : > { %942 = dma.hbm_to_vmem [thread:$0]  (!%p1355_p11), %s1632_s3, 256, %s212_s7, [#allocation9], %s1608_s13, %s1608_s13, %s1610_s14  }
  0x2d   : > { %s1634_s18 = scalar_select %p1387_p7, 1, 0 }
  0x2e   : > { %s1397_s26 = sshll.u32 %s1607_s19, 3  ;;  %p1399_p9 = pnand %p966_p3, %p43_p5 }
  0x2f   : > { %s269_s7 = sand.u32 1, %s1258_s24   ;;  %s1636_s1 = sld [smem:[#allocation23_spill]] }
  0x30   : > { %s273_s15 = scalar_lea.vmem [#allocation5], %s1397_s26  ;;  %s1411_s19 = scalar_lea.sflag [#allocation6], %s269_s7 }
  0x31   : > { %s280_s16 = sshll.u32 %s273_s15, 4  ;;  %p1417_p10 = pneg %p1399_p9  ;;  %s281_s16 = int_to_ptr.vmem [resolvable:$true] %s280_s16 }
  0x35   : > { %s1408_s12 = scalar_lea.hbm %s1636_s1, %s1393_s20  ;;  %s1051_s3 = scalar_lea.hbm %s1636_s1, 256 }
  0x36   : > { %s1046_s13 = scalar_lea.hbm %s1408_s12, 128  ;;  %p1052_p3 = scmp.lt.s32.totalorder %s1408_s12, %s1636_s1 }
  0x37   : > { %p1047_p2 = scmp.ne.s32.totalorder %s1408_s12, %s1046_s13  ;;  %p1053_p5 = scmp.lt.s32.totalorder %s1051_s3, %s1046_s13 }
  0x39   : > { %p1049_p13 = pnand %p1417_p10, %p1047_p2  ;;  %p1054_p1 = por %p1053_p5, %p1052_p3 }
  0x3b   : > { %p1050_p0 = pneg %p1049_p13 }
  0x3d   : > { %p1055_p12 = pnand %p1054_p1, %p1050_p0 }
  0x3f   : > { %1058 = shalt.err (!%p1055_p12)
}
  0x40   : > { %s1059_s7 = scalar_lea.vmem %s281_s16, 128  ;;  %s1263_s9 = smov [#allocation5]  }
  0x41   : > { %p1060_p6 = scmp.ne.s32.totalorder %s281_s16, %s1059_s7  ;;  %s1064_s24 = sshll.u32 %s1263_s9, 4  ;;  %s1065_s24 = int_to_ptr.vmem [resolvable:$false] %s1064_s24 }
  0x42   : > { %s1066_s28 = scalar_lea.vmem %s1065_s24, 256  ;;  %p1067_p2 = scmp.lt.s32.totalorder %s281_s16, %s1065_s24 }
  0x43   : > { %p1062_p7 = pnand %p1060_p6, %p1417_p10  ;;  %p1068_p13 = scmp.lt.s32.totalorder %s1066_s28, %s1059_s7 }
  0x45   : > { %p1063_p4 = pneg %p1062_p7  ;;  %p1069_p8 = por %p1068_p13, %p1067_p2 }
  0x47   : > { %p1070_p11 = pnand %p1069_p8, %p1063_p4 }
  0x49   : > { %1073 = shalt.err (!%p1070_p11)
}
  0x4a   : > { %955 = dma.hbm_to_vmem [thread:$0]  (!%p1399_p9), %s1408_s12, 128, %s281_s16, %s1411_s19  }
  0x4b   : > { %s1264_s3 = smov [#allocation10]   ;;  %s1265_s17 = smov [#allocation11]  }
  0x4c   : > { %s224_s13 = sshll.u32 %s1264_s3, 4  ;;  %s237_s10 = sshll.u32 %s1265_s17, 4  ;;  %s225_s13 = int_to_ptr.vmem [resolvable:$true] %s224_s13  ;;  %s238_s10 = int_to_ptr.vmem [resolvable:$true] %s237_s10 }
  0x4d   : > { %s1085_s11 = scalar_lea.vmem %s225_s13, 256  ;;  %p1638_p6 = scmp.ne.s32.totalorder %s1630_s8, 0 }
  0x4e   : > { %p1086_p1 = scmp.ne.s32.totalorder %s225_s13, %s1085_s11  ;;  %p1093_p3 = scmp.lt.s32.totalorder %s225_s13, %s225_s13 }
  0x4f   : > { %p1639_p12 = pneg %p1638_p6  ;;  %p1094_p4 = scmp.lt.s32.totalorder %s1085_s11, %s1085_s11 }
  0x51   : > { %p1088_p7 = pnand %p1086_p1, %p1639_p12  ;;  %p1095_p8 = por %p1094_p4, %p1093_p3 }
  0x53   : > { %p1089_p0 = pneg %p1088_p7 }
  0x55   : > { %p1096_p11 = pnand %p1095_p8, %p1089_p0 }
  0x57   : > { %1099 = shalt.err (!%p1096_p11)
}
  0x58   : > { %s1640_s24 = smov 4   ;;  %s1641_s28 = smov 64  }
  0x59   : > { %945 = dma.hbm_to_vmem [thread:$0]  (!%p1638_p6), %s1604_s4, 256, %s225_s13, [#allocation9], %s1641_s28, %s1641_s28, %s1640_s24  }
  0x5a   : > { %s1111_s16 = scalar_lea.vmem %s238_s10, 256  ;;  %p1642_p2 = pmov %p1639_p12 }
  0x5b   : > { %p1112_p5 = scmp.ne.s32.totalorder %s238_s10, %s1111_s16  ;;  %p1119_p12 = scmp.lt.s32.totalorder %s238_s10, %s238_s10 }
  0x5c   : > { %p1120_p7 = scmp.lt.s32.totalorder %s1111_s16, %s1111_s16 }
  0x5d   : > { %p1114_p13 = pnand %p1112_p5, %p1642_p2 }
  0x5e   : > { %p1121_p0 = por %p1120_p7, %p1119_p12 }
  0x5f   : > { %p1115_p1 = pneg %p1114_p13 }
  0x61   : > { %p1122_p3 = pnand %p1121_p0, %p1115_p1 }
  0x63   : > { %1125 = shalt.err (!%p1122_p3)
}
  0x64   : > { %948 = dma.hbm_to_vmem [thread:$0]  (!%p1638_p6), %s1605_s5, 256, %s238_s10, [#allocation12], %s1641_s28, %s1641_s28, %s1640_s24  }
  0x65   : > { %s1462_s17 = scalar_lea.hbm %s1600_s0, %s1393_s20  ;;  %s255_s8 = scalar_lea.vmem [#allocation2], %s1397_s26 }
  0x66   : > { %s262_s11 = sshll.u32 %s255_s8, 4  ;;  %s1469_s16 = scalar_lea.hbm %s1602_s2, %s1393_s20  ;;  %s263_s11 = int_to_ptr.vmem [resolvable:$true] %s262_s11 }
  0x67   : > { %s1643_s15 = sand.u32 1, %s1254_s23   ;;  %s1126_s1 = scalar_lea.hbm %s1462_s17, 128 }
  0x68   : > { %s252_s7 = scalar_lea.sflag [#allocation3], %s1643_s15  ;;  %p1127_p6 = scmp.ne.s32.totalorder %s1462_s17, %s1126_s1 }
  0x69   : > { %s1131_s28 = scalar_lea.hbm %s1600_s0, 256  ;;  %p1132_p11 = scmp.lt.s32.totalorder %s1462_s17, %s1600_s0 }
  0x6a   : > { %p1129_p4 = pnand %p1127_p6, %p1417_p10  ;;  %p1133_p5 = scmp.lt.s32.totalorder %s1131_s28, %s1126_s1 }
  0x6c   : > { %p1130_p8 = pneg %p1129_p4  ;;  %p1134_p2 = por %p1133_p5, %p1132_p11 }
  0x6e   : > { %p1135_p13 = pnand %p1134_p2, %p1130_p8 }
  0x70   : > { %1138 = shalt.err (!%p1135_p13)
}
  0x71   : > { %s1139_s20 = scalar_lea.vmem %s263_s11, 128  ;;  %s1266_s8 = smov [#allocation2]  }
  0x72   : > { %p1140_p1 = scmp.ne.s32.totalorder %s263_s11, %s1139_s20  ;;  %s1144_s9 = sshll.u32 %s1266_s8, 4  ;;  %s1145_s9 = int_to_ptr.vmem [resolvable:$false] %s1144_s9 }
  0x73   : > { %s1146_s12 = scalar_lea.vmem %s1145_s9, 256  ;;  %p1147_p0 = scmp.lt.s32.totalorder %s263_s11, %s1145_s9 }
  0x74   : > { %p1142_p12 = pnand %p1140_p1, %p1417_p10  ;;  %p1148_p3 = scmp.lt.s32.totalorder %s1146_s12, %s1139_s20 }
  0x76   : > { %p1143_p7 = pneg %p1142_p12  ;;  %p1149_p6 = por %p1148_p3, %p1147_p0 }
  0x78   : > { %p1150_p4 = pnand %p1149_p6, %p1143_p7 }
  0x7a   : > { %1153 = shalt.err (!%p1150_p4)
}
  0x7b   : > { %952 = dma.hbm_to_vmem [thread:$0]  (!%p1399_p9), %s1462_s17, 128, %s263_s11, %s252_s7  }
  0x7c   : > { %s291_s1 = scalar_lea.vmem [#allocation7], %s1397_s26  ;;  %s1154_s10 = scalar_lea.hbm %s1469_s16, 128 }
  0x7d   : > { %s298_s15 = sshll.u32 %s291_s1, 4  ;;  %p1155_p8 = scmp.ne.s32.totalorder %s1469_s16, %s1154_s10  ;;  %s299_s15 = int_to_ptr.vmem [resolvable:$true] %s298_s15 }
  0x7e   : > { %s1159_s3 = scalar_lea.hbm %s1602_s2, 256  ;;  %p1160_p2 = scmp.lt.s32.totalorder %s1469_s16, %s1602_s2 }
  0x7f   : > { %p1157_p11 = pnand %p1155_p8, %p1417_p10  ;;  %p1161_p13 = scmp.lt.s32.totalorder %s1159_s3, %s1154_s10 }
  0x81   : > { %p1158_p5 = pneg %p1157_p11  ;;  %p1162_p1 = por %p1161_p13, %p1160_p2 }
  0x83   : > { %p1163_p12 = pnand %p1162_p1, %p1158_p5 }
  0x85   : > { %1166 = shalt.err (!%p1163_p12)
}
  0x86   : > { %s1167_s26 = scalar_lea.vmem %s299_s15, 128  ;;  %s1267_s17 = smov [#allocation7]  }
  0x87   : > { %p1168_p7 = scmp.ne.s32.totalorder %s299_s15, %s1167_s26  ;;  %s1172_s11 = sshll.u32 %s1267_s17, 4  ;;  %s1173_s11 = int_to_ptr.vmem [resolvable:$false] %s1172_s11 }
  0x88   : > { %s1174_s7 = scalar_lea.vmem %s1173_s11, 256  ;;  %p1175_p6 = scmp.lt.s32.totalorder %s299_s15, %s1173_s11 }
  0x89   : > { %p1170_p0 = pnand %p1168_p7, %p1417_p10  ;;  %p1176_p4 = scmp.lt.s32.totalorder %s1174_s7, %s1167_s26 }
  0x8b   : > { %p1171_p3 = pneg %p1170_p0  ;;  %p1177_p8 = por %p1176_p4, %p1175_p6 }
  0x8d   : > { %p1178_p11 = pnand %p1177_p8, %p1171_p3 }
  0x8f   : > { %1181 = shalt.err (!%p1178_p11)
}
  0x90   : > { %958 = dma.hbm_to_vmem [thread:$0]  (!%p1399_p9), %s1469_s16, 128, %s299_s15, %s1411_s19  }
  0x91   : > { %p1644_p5 = scmp.ne.s32.totalorder %s1629_s29, 0 }
  0x92   : > { %s1510_s14 = sand.u32 (!%p1644_p5), 1, %s1250_s22   ;;  %p1645_p10 = scmp.ne.s32.totalorder (!%p1644_p5), %s1626_s27, 0 }
  0x93   : > { %307 = sbr.rel (%p1644_p5) target bundleno = 938 (0x3aa), region = 44  ;;  %s1513_s8 = sshll.u32 (!%p1644_p5), %s1510_s14, 3 }
  0x94   : > { %s310_s9 = scalar_lea.sflag (!%p1644_p5), [#allocation3], %s1510_s14  ;;  %s313_s12 = scalar_lea.vmem (!%p1644_p5), [#allocation2], %s1513_s8 }
  0x98   : > { %1225 = dma.done.wait (%p1645_p10), %s310_s9, 128  }
  0x99   : > { %1227 = vsyncadd (%p1645_p10), %s310_s9, 4294967168  ;;  %s318_s29 = sand.u32 1, %s1327_s25   ;;  %s322_s30 = scalar_lea.vmem [#allocation5], %s1513_s8 }
  0x9a   : > { %s319_s19 = scalar_lea.sflag [#allocation6], %s318_s29 }
  0x9b   : > { %1229 = dma.done.wait (%p1645_p10), %s319_s19, 256  }
  0x9c   : > { %1231 = vsyncadd (%p1645_p10), %s319_s19, 4294967040  ;;  %s331_s16 = scalar_lea.vmem [#allocation7], %s1513_s8  ;;  %p1646_p9 = scmp.eq.s32.totalorder %s1327_s25, 0 }
  0x9e   : > { %1233 = dma.done.wait (%p1646_p9), [#allocation9], 512   ;;  %p1647_p2 = pmov %p1646_p9 }
  0xa0   : > { %1235 = vsyncadd (%p1647_p2), [#allocation9], 4294966784  ;;  %p1648_p13 = pmov %p1647_p2 }
  0xa1   : > { %p1649_p1 = pmov %p1647_p2 }
  0xa2   : > { %1237 = dma.done.wait (%p1648_p13), [#allocation12], 256  }
  0xa3   : > { %1239 = vsyncadd (%p1649_p1), [#allocation12], 4294967040  ;;  %v1268_v0 = vmov 0.0   ;;  %vm1269_vm0 = vmmov 0   ;;  %v1010_v1 = vld [vmem:[#allocation10 + $0x8] sm:$0xff]   ;;  %v1011_v2 = vld [vmem:[#allocation8 + $0x8] sm:$0xff]  }
  0xa4   : > { %891 = vmatprep.subr.bf16.mxu1 %v1268_v0  ;;  %883 = vmatprep.subr.bf16.mxu0 %v1268_v0  ;;  %v1012_v3 = vld [vmem:[#allocation10] sm:$0xff]   ;;  %v1013_v4 = vld [vmem:[#allocation8] sm:$0xff]   ;;  %vm405_vm1 = vcmask 261120   ;;  %v1014_v9 = vld [vmem:[#allocation11 + $0x8] sm:$0xff]   ;;  %vm616_vm2 = vcmask 64512   ;;  %vm632_vm3 = vcmask 1043456  }
  0xa5   : > { %895 = vmatprep.mubr.msk.bf16.mxu1 %vm1269_vm0, %v1268_v0  ;;  %887 = vmatprep.mubr.msk.bf16.mxu0 %vm1269_vm0, %v1268_v0  ;;  %v385_v5 = vld [vmem:[%s322_s30] sm:$0xff]  ;;  %v383_v6 = vld [vmem:[%s313_s12] sm:$0xff]  ;;  %s867_s27 = sshll.u32 %s1327_s25, 7  ;;  %s381_s1 = scalar_lea.vmem [#allocation13], %s1513_s8 }
  0xa6   : > { %892 = vmatpush3.bf16.msra.mxu1 %v1010_v1  ;;  %884 = vmatpush3.bf16.msra.mxu0 %v1011_v2  ;;  %v386_v7 = vpack.c.bf16 %v385_v5, %v385_v5  ;;  %v384_v8 = vpack.c.bf16 %v383_v6, %v383_v6  ;;  %v1015_v10 = vld [vmem:[#allocation11] sm:$0xff]   ;;  %v387_v11 = vld [vmem:[%s331_s16] sm:$0xff]  ;;  %s693_s15 = sshll.u32 %s381_s1, 4  ;;  %s1556_s28 = scalar_lea.hbm %s1606_s6, %s867_s27  ;;  %s1558_s15 = int_to_ptr.vmem [resolvable:$true] %s693_s15 }
  0xa7   : > { %893 = vmatprep.subr.bf16.mxu1 %v1268_v0  ;;  %885 = vmatprep.subr.bf16.mxu0 %v1268_v0  ;;  %v388_v12 = vpack.c.bf16 %v387_v11, %v387_v11  ;;  %s680_s25 = scalar_lea.sflag [#allocation4], %s1510_s14  ;;  %s1182_s3 = scalar_lea.vmem %s1558_s15, 128 }
  0xa8   : > { %p1183_p12 = scmp.ne.s32.totalorder %s1558_s15, %s1182_s3  ;;  %p1650_p7 = scmp.ne.s32.totalorder %s1634_s18, 0 }
  0xa9   : > { %s1270_s13 = smov [#allocation13]  }
  0xaa   : > { %894 = vmatpush3.bf16.msra.mxu1 %v1012_v3  ;;  %886 = vmatpush3.bf16.msra.mxu0 %v1013_v4  ;;  %p1184_p0 = pnand %p1183_p12, %p1650_p7  ;;  %s1186_s20 = sshll.u32 %s1270_s13, 4  ;;  %s1187_s20 = int_to_ptr.vmem [resolvable:$false] %s1186_s20 }
  0xab   : > { %907 = vmatprep.subr.bf16.mxu1 %v1268_v0  ;;  %899 = vmatprep.subr.bf16.mxu0 %v1268_v0  ;;  %s1188_s26 = scalar_lea.vmem %s1187_s20, 256  ;;  %p1189_p6 = scmp.lt.s32.totalorder %s1558_s15, %s1187_s20 }
  0xac   : > { %p1185_p3 = pneg %p1184_p0  ;;  %p1190_p4 = scmp.lt.s32.totalorder %s1188_s26, %s1182_s3 }
  0xad   : > { %896 = vmatmul.mubr.msk.bf16.vlgmr.msra.gmra.mxu1 %vm405_vm1, %v386_v7  ;;  %888 = vmatmul.mubr.msk.bf16.vlgmr.msra.gmra.mxu0 %vm405_vm1, %v384_v8 }
  0xae   : > { %909 = vmatprep.mubr.msk.bf16.mxu1 %vm1269_vm0, %v1268_v0  ;;  %903 = vmatprep.mubr.msk.bf16.mxu0 %vm1269_vm0, %v1268_v0  ;;  %p1191_p8 = por %p1190_p4, %p1189_p6 }
  0xaf   : > { %900 = vmatpush3.bf16.msra.mxu0 %v1014_v9 }
  0xb0   : > { %901 = vmatprep.subr.bf16.mxu0 %v1268_v0  ;;  %p1192_p11 = pnand %p1191_p8, %p1185_p3 }
  0xb3   : > { %902 = vmatpush3.bf16.msra.mxu0 %v1015_v10 }
  0xb4   : > { %913 = vmatprep.subr.bf16.mxu0 %v1268_v0 }
  0xb6   : > { %904 = vmatmul.mubr.msk.bf16.vlgmr.msra.gmra.mxu0 %vm405_vm1, %v388_v12 }
  0xb7   : > { %915 = vmatprep.mubr.msk.bf16.mxu0 %vm1269_vm0, %v1268_v0 }
 0x16d   : > { %v502_v13 = vpop.f32.mrf.mxu1  ;;  %v443_v15 = vpop.f32.mrf.mxu0 }
 0x16e   : > { %v568_v14 = vpack.c.bf16 %v502_v13, %v502_v13  ;;  %v567_v22 = vpack.c.bf16 %v443_v15, %v443_v15 }
 0x16f   : > { %v897_v16 = vpop.f32.mrf.mxu1  ;;  %v889_v18 = vpop.f32.mrf.mxu0 }
 0x170   : > { %v574_v17 = vsel %vm405_vm1, %v568_v14, 0 }
 0x171   : > { %v505_v19 = vpop.f32.mrf.mxu1  ;;  %908 = vmatpush3.bf16.xpose.msra.mxu1 %v574_v17  ;;  %v446_v20 = vpop.f32.mrf.mxu0 }
 0x173   : > { %v898_v21 = vpop.f32.mrf.mxu1  ;;  %v890_v23 = vpop.f32.mrf.mxu0 }
 0x176   : > { %v561_v29 = vpop.f32.mrf.mxu0 }
 0x177   : > { %v569_v30 = vpack.c.bf16 %v561_v29, %v561_v29 }
 0x178   : > { %910 = vmatmul.mubr.msk.bf16.vlgmr.msra.gmra.mxu1 %vm405_vm1, %v567_v22  ;;  %v905_v31 = vpop.f32.mrf.mxu0 }
 0x179   : > { %v634_v32 = vsel %vm632_vm3, %v569_v30, 0 }
 0x17a   : > { %v564_v33 = vpop.f32.mrf.mxu0  ;;  %914 = vmatpush3.bf16.msra.mxu0 %v634_v32 }
 0x17c   : > { %v906_v34 = vpop.f32.mrf.mxu0 }
 0x238   : > { %v610_v24 = vpop.f32.mrf.mxu1 }
 0x239   : > { %v617_v25 = vsel %vm616_vm2, %v610_v24, -inf }
 0x23a   : > { %618 = vmax.xlane.f32.xlu0 %v617_v25  ;;  %v911_v26 = vpop.f32.mrf.mxu1 }
 0x23c   : > { %v613_v27 = vpop.f32.mrf.mxu1 }
 0x23e   : > { %v912_v28 = vpop.f32.mrf.mxu1 }
 0x2c3   : > { %v619_v35 = vpop.xlane.xlu0 %618 }
 0x2c4   : > { %v620_v36 = vsub.f32 %v610_v24, %v619_v35 }
 0x2c6   : > { %v621_v37 = vpack.c.bf16 %v620_v36, %v620_v36 }
 0x2c8   : > { %v623_v38 = vmul.bf16 1069105081, %v621_v37 }
 0x2ca   : > { %1016 = vpow.bf16 %v623_v38 }
 0x2d8   : > { %v1017_v39 = vpop.eup %1016 }
 0x2d9   : > { %916 = vmatmul.mubr.msk.bf16.vlgmr.msra.gmra.mxu0 %vm616_vm2, %v1017_v39  ;;  %v625_v40 = vunpack.c.l.bf16 %v1017_v39 }
 0x2db   : > { %v626_v41 = vsel %vm616_vm2, %v625_v40, 0.0 }
 0x2dc   : > { %627 = vadd.xlane.f32.xlu0 %v626_v41 }
 0x365   : > { %v628_v42 = vpop.xlane.xlu0 %627 }
 0x366   : > { %1018 = vrcp.f32 %v628_v42 }
 0x373   : > { %v1019_v43 = vpop.eup %1018 }
 0x399   : > { %v670_v44 = vpop.f32.mrf.mxu0 }
 0x39a   : > { %v677_v45 = vmul.f32 %v1019_v43, %v670_v44 }
 0x39b   : > { %v917_v46 = vpop.f32.mrf.mxu0 }
 0x39c   : > { %678 = vst.msk [vmem:[%s381_s1] sm:$0xff] %vm405_vm1, %v677_v45 }
 0x39d   : > { %v673_v47 = vpop.f32.mrf.mxu0 }
 0x39e   : > { %1195 = shalt.err (!%p1192_p11)
}
 0x39f   : > { %s1196_s17 = scalar_lea.hbm %s1556_s28, 128  ;;  %s1200_s14 = scalar_lea.hbm %s1606_s6, 256 }
 0x3a0   : > { %p1197_p5 = scmp.ne.s32.totalorder %s1556_s28, %s1196_s17  ;;  %p1201_p2 = scmp.lt.s32.totalorder %s1556_s28, %s1606_s6 }
 0x3a1   : > { %p1202_p13 = scmp.lt.s32.totalorder %s1200_s14, %s1196_s17 }
 0x3a2   : > { %p1198_p10 = pnand %p1197_p5, %p1650_p7 }
 0x3a3   : > { %p1203_p1 = por %p1202_p13, %p1201_p2 }
 0x3a4   : > { %p1199_p9 = pneg %p1198_p10 }
 0x3a6   : > { %p1204_p12 = pnand %p1203_p1, %p1199_p9 }
 0x3a8   : > { %1207 = shalt.err (!%p1204_p12)
}
 0x3a9   : > { %937 = dma.vmem_to_hbm [thread:$0]  (%p1650_p7), %s1558_s15, 128, %s1556_s28, %s680_s25   ;;  %v918_v48 = vpop.f32.mrf.mxu0 }
 0x3aa PF: > { %s1651_s12 = sld [smem:[#allocation20_spill]]  ;;  %s705_s19 = sand.u32 1, %s1246_s21  }
 0x3ab   : > { %s1652_s29 = sld [smem:[#allocation19_spill]]  ;;  %s706_s30 = scalar_lea.sflag [#allocation4], %s705_s19 }
 0x3b0   : > { %p1653_p0 = scmp.ne.s32.totalorder %s1651_s12, 0 }
 0x3b1   : > { %p1654_p3 = scmp.ge.s32.totalorder %s1652_s29, 2 }
 0x3b3   : > { %p960_p6 = pnand %p1654_p3, %p1653_p0 }
 0x3b5   : > { %p961_p4 = pneg %p960_p6 }
 0x3b7   : > { %1241 = dma.done.wait (%p961_p4), %s706_s30, 128  }
 0x3b8   : > { %1243 = vsyncadd (%p961_p4), %s706_s30, 4294967168  ;;  %s1655_s24 = sld [smem:[#allocation21_spill]]  ;;  %s1657_s21 = smov %s1250_s22 }
 0x3b9   : > { %s1656_s18 = sld [smem:[#allocation22_spill]]  ;;  %s1658_s22 = smov %s1254_s23 }
 0x3be   : > { %p24_p8 = scmp.ge.s32.totalorder %s1655_s24, 4  }
 0x3bf   : > { %s1659_s23 = smov %s1656_s18 }
 0x3c0   :  { %26 = sbr.rel (!%p24_p8) target bundleno = 12 (0xc), region = 125 }
 0x3c5   :  { %711 = vsyncpa [#allocation3], 1 }
 0x3c6   :  { %713 = vsyncpa [#allocation3 + $0x1], 1 }
 0x3c7   :  { %714 = vsyncpa [#allocation6], 1 }
 0x3c8   :  { %716 = vsyncpa [#allocation6 + $0x1], 1 }
 0x3c9   :  { %717 = vsyncpa [#allocation9], 1 }
 0x3ca   :  { %718 = vsyncpa [#allocation12], 1 }
 0x3cb   :  { %719 = vsyncpa [#allocation4], 1 }
 0x3cc   :  { %721 = vsyncpa [#allocation4 + $0x1], 1 }

</bundles_post_ra>
